<compile_context>
chip_gen: v7x
topology: tpu7x:2x2x1
jax: 0.10.0
libtpu: 0.0.40
codegen_flags: <defaults>
</compile_context>

<pallas_src>
import math
from functools import partial

import jax
import jax.numpy as jnp
from jax.experimental import pallas as pl
from jax.experimental.pallas import tpu as pltpu


def _round_up(x: int, m: int) -> int:
    return (x + m - 1) // m * m


def _pick_tn(Hp: int, block_n) -> int:
    """Column-tile width for w2: multiple of 128 that divides Hp."""
    if block_n is not None:
        tn = min(_round_up(block_n, 128), Hp)
    else:
        tn = min(Hp, 1024)
    while Hp % tn:
        tn -= 128
    return max(tn, 128)


def timestep_embedder_kernel(t_ref, freqs_ref, w1_ref, b1_ref, w2_ref, b2_ref, o_ref):
    # t_ref:     (TB, 1)    f32   timestep batch tile
    # freqs_ref: (1, half)  f32   sinusoidal frequencies       (grid-invariant)
    # w1_ref:    (F, Hp)    bf16  first Linear weight (in,out) (grid-invariant)
    # b1_ref:    (1, Hp)    f32                                 (grid-invariant)
    # w2_ref:    (Hp, TN)   bf16  second Linear weight column tile
    # b2_ref:    (1, TN)    f32   second Linear bias column tile
    # o_ref:     (TB, TN)   out_dtype
    args = t_ref[...] * freqs_ref[...]                               # (TB, half) f32
    # Lane concat [cos | sin] -> single K=F MXU push for the first Linear.
    emb = jnp.concatenate([jnp.cos(args), jnp.sin(args)], axis=-1)   # (TB, F) f32

    h = jnp.dot(emb.astype(w1_ref.dtype), w1_ref[...],
                preferred_element_type=jnp.float32) + b1_ref[...]    # (TB, Hp) f32
    h = h * jax.nn.sigmoid(h)                                        # SiLU in f32

    out = jnp.dot(h.astype(w2_ref.dtype), w2_ref[...],
                  preferred_element_type=jnp.float32) + b2_ref[...]  # (TB, TN) f32
    o_ref[...] = out.astype(o_ref.dtype)


@partial(jax.jit, static_argnames=("hidden_size", "frequency_embedding_size",
                                   "out_dtype", "block_b", "block_n"))
def timestep_embedder(t, params, *, hidden_size, frequency_embedding_size=256,
                      out_dtype=jnp.bfloat16, block_b=128, block_n=None):
    """t: (B,) float timesteps. params: output of prepare_params().
    Returns (B, hidden_size) in out_dtype."""
    F = frequency_embedding_size
    assert F % 2 == 0, "odd frequency_embedding_size not supported"
    half = F // 2

    w1, b1, w2, b2 = params["w1"], params["b1"], params["w2"], params["b2"]
    Hp = w1.shape[1]                       # already padded to a multiple of 128
    H = hidden_size
    B = t.shape[0]
    assert w1.shape == (F, Hp) and w2.shape == (Hp, Hp)
    assert b1.shape == (1, Hp) and b2.shape == (1, Hp)

    # Batch tiling (sublane multiple of 8), capped at block_b.
    TB = max(8, min(_round_up(block_b, 8), _round_up(B, 8)))
    Bp = _round_up(B, TB)
    nbatch = Bp // TB
    t2d = t.astype(jnp.float32).reshape(B, 1)
    if Bp != B:
        t2d = jnp.pad(t2d, ((0, Bp - B), (0, 0)))

    # Output-column tiling of w2 (dominant DMA/compute): caps the resident w2 block
    # and gives grid >= 2 for v7x megacore even when the batch grid is (1,).
    TN = _pick_tn(Hp, block_n)
    ncols = Hp // TN

    # Sinusoidal frequencies — no traced deps, constant-folded by XLA at compile time.
    max_period = 10000.0
    freqs = jnp.exp(
        -math.log(max_period) * jnp.arange(half, dtype=jnp.float32) / half
    ).reshape(1, half)

    out_item = jnp.dtype(out_dtype).itemsize
    cost = pl.CostEstimate(
        flops=2 * Bp * F * Hp * ncols + 2 * Bp * Hp * Hp,
        transcendentals=Bp * F * ncols + Bp * Hp,
        bytes_accessed=(2 * (F * Hp + Hp * Hp)     # bf16 weights
                        + 4 * 2 * Hp               # f32 biases
                        + 4 * Bp                   # timesteps
                        + out_item * Bp * Hp),     # output
    )

    # Explicit scoped-VMEM budget from actual buffer sizes (+ intermediates headroom).
    buf_bytes = (2 * TB * 128 * 4                       # t tile, lane-padded, 2 bufs
                 + 8 * _round_up(half, 128) * 4         # freqs, single-buffered
                 + F * Hp * 2 + 8 * Hp * 4              # w1 + b1, single-buffered
                 + 2 * (Hp * TN * 2)                    # w2 column tile, 2 bufs
                 + 2 * (8 * _round_up(TN, 128) * 4)     # b2 column tile, 2 bufs
                 + 2 * TB * TN * out_item)              # output tile, 2 bufs
    inter_bytes = 4 * TB * (F + Hp + 2 * TN)            # emb / h / f32 accum (rough)
    vmem_limit = min(64 << 20, buf_bytes + 2 * inter_bytes + (2 << 20))

    out = pl.pallas_call(
        timestep_embedder_kernel,
        out_shape=jax.ShapeDtypeStruct((Bp, Hp), out_dtype),
        grid_spec=pltpu.PrefetchScalarGridSpec(
            num_scalar_prefetch=0,
            # (column tiles, batch tiles): w2 tile fetched once per column, all batch
            # tiles reuse it; both axes independent -> "parallel" for v7x megacore.
            grid=(ncols, nbatch),
            in_specs=[
                pl.BlockSpec((TB, 1), lambda j, i: (i, 0)),                    # t
                pl.BlockSpec((1, half), lambda j, i: (0, 0),
                             pipeline_mode=pl.Buffered(1)),                    # freqs
                pl.BlockSpec((F, Hp), lambda j, i: (0, 0),
                             pipeline_mode=pl.Buffered(1)),                    # w1
                pl.BlockSpec((1, Hp), lambda j, i: (0, 0),
                             pipeline_mode=pl.Buffered(1)),                    # b1
                pl.BlockSpec((Hp, TN), lambda j, i: (0, j)),                   # w2 col
                pl.BlockSpec((1, TN), lambda j, i: (0, j)),                    # b2 col
            ],
            out_specs=pl.BlockSpec((TB, TN), lambda j, i: (i, j)),
        ),
        compiler_params=pltpu.CompilerParams(
            dimension_semantics=("parallel", "parallel"),
            vmem_limit_bytes=int(vmem_limit),
        ),
        cost_estimate=cost,
    )(t2d, freqs, w1, b1, w2, b2)

    # Slice only if padding actually happened (no-op copy avoided in the common case).
    if Bp != B or Hp != H:
        out = out[:B, :H]
    return out


def init_params(key, hidden_size, frequency_embedding_size=256):
    """Raw f32 params mirroring the PyTorch init (weights stored (in, out))."""
    k1, k2 = jax.random.split(key)
    w1 = 0.01 * jax.random.normal(
        k1, (frequency_embedding_size, hidden_size), dtype=jnp.float32)
    b1 = jnp.zeros((hidden_size,), dtype=jnp.float32)
    w2 = 0.01 * jax.random.normal(
        k2, (hidden_size, hidden_size), dtype=jnp.float32)
    b2 = jnp.zeros((hidden_size,), dtype=jnp.float32)
    return {"w1": w1, "b1": b1, "w2": w2, "b2": b2}


def prepare_params(params, weight_dtype=jnp.bfloat16):
    """One-time prep (outside jit): pad hidden dim to a multiple of 128 (lane-dense),
    cast weights to bf16, reshape biases to (1, Hp) f32. Returns (prepared, H)."""
    w1, b1, w2, b2 = params["w1"], params["b1"], params["w2"], params["b2"]
    H = w1.shape[1]
    Hp = _round_up(H, 128)
    if Hp != H:
        w1 = jnp.pad(w1, ((0, 0), (0, Hp - H)))
        b1 = jnp.pad(b1, (0, Hp - H))
        w2 = jnp.pad(w2, ((0, Hp - H), (0, Hp - H)))
        b2 = jnp.pad(b2, (0, Hp - H))
    prepared = {
        "w1": jax.device_put(w1.astype(weight_dtype)),
        "b1": jax.device_put(b1.astype(jnp.float32).reshape(1, Hp)),
        "w2": jax.device_put(w2.astype(weight_dtype)),
        "b2": jax.device_put(b2.astype(jnp.float32).reshape(1, Hp)),
    }
    return prepared, H


def reference(t, params, frequency_embedding_size=256):
    """Pure-JAX f32 reference mirroring the PyTorch forward."""
    half = frequency_embedding_size // 2
    max_period = 10000.0
    freqs = jnp.exp(-math.log(max_period) *
                    jnp.arange(half, dtype=jnp.float32) / half)
    args = t.astype(jnp.float32)[:, None] * freqs[None, :]
    emb = jnp.concatenate([jnp.cos(args), jnp.sin(args)], axis=-1)
    h = emb @ params["w1"] + params["b1"]
    h = h * jax.nn.sigmoid(h)
    return h @ params["w2"] + params["b2"]


if __name__ == "__main__":
    freq_size = 256
    B = 8
    key = jax.random.PRNGKey(0)
    kp, kt, kp2 = jax.random.split(key, 3)
    # Timesteps in [0, 1000), like typical diffusion schedules.
    t = jax.random.uniform(kt, (B,), dtype=jnp.float32) * 1000.0

    # Lane-dense hidden size (multiple of 128), bf16 output (default).
    hidden_size = 128
    raw = init_params(kp, hidden_size, freq_size)
    prepared, H = prepare_params(raw)
    out = timestep_embedder(t, prepared, hidden_size=H,
                            frequency_embedding_size=freq_size)
    out = jax.block_until_ready(out)
    ref = reference(t, raw, freq_size)
    assert out.shape == (B, hidden_size)
    assert out.dtype == jnp.bfloat16
    # bf16 weights + bf16 output (f32 accumulation) -> loose tolerance.
    assert jnp.allclose(out.astype(jnp.float32), ref, atol=2e-3, rtol=2e-2), \
        "mismatch vs reference (H=128)"

    # Also exercise the non-multiple-of-128 padding path, with f32 output.
    hidden_small = 32
    raw_s = init_params(kp2, hidden_small, freq_size)
    prep_s, H_s = prepare_params(raw_s)
    out_s = timestep_embedder(t, prep_s, hidden_size=H_s,
                              frequency_embedding_size=freq_size,
                              out_dtype=jnp.float32)
    out_s = jax.block_until_ready(out_s)
    ref_s = reference(t, raw_s, freq_size)
    assert out_s.shape == (B, hidden_small)
    assert jnp.allclose(out_s, ref_s, atol=2e-3, rtol=2e-2), \
        "mismatch vs reference (H=32)"

    print("KERNEL_OK")
</pallas_src>

<mosaic_0001>
module attributes {stable_mosaic.version = 11 : i64} {
  func.func @timestep_embedder_kernel(%arg0: i32, %arg1: i32, %arg2: memref<8x1xf32, #tpu.memory_space<vmem>>, %arg3: memref<1x128xf32, #tpu.memory_space<vmem>>, %arg4: memref<256x128xbf16, #tpu.memory_space<vmem>>, %arg5: memref<1x128xf32, #tpu.memory_space<vmem>>, %arg6: memref<128x128xbf16, #tpu.memory_space<vmem>>, %arg7: memref<1x128xf32, #tpu.memory_space<vmem>>, %arg8: memref<8x128xbf16, #tpu.memory_space<vmem>>) attributes {dimension_semantics = [#tpu.dimension_semantics<parallel>, #tpu.dimension_semantics<parallel>], iteration_bounds = array<i64: 1, 1>, scalar_prefetch = 0 : i64, scratch_operands = 0 : i64, tpu.core_type = #tpu.core_type<tc>, window_params = [{transform_indices = @transform_0, window_bounds = array<i64: 8, 1>}, {pipeline_mode = #tpu.pipeline_mode<synchronous>, transform_indices = @transform_1, window_bounds = array<i64: 1, 128>}, {pipeline_mode = #tpu.pipeline_mode<synchronous>, transform_indices = @transform_2, window_bounds = array<i64: 256, 128>}, {pipeline_mode = #tpu.pipeline_mode<synchronous>, transform_indices = @transform_3, window_bounds = array<i64: 1, 128>}, {transform_indices = @transform_4, window_bounds = array<i64: 128, 128>}, {transform_indices = @transform_5, window_bounds = array<i64: 1, 128>}, {transform_indices = @transform_6, window_bounds = array<i64: 8, 128>}]} {
    %c0 = arith.constant 0 : index
    %c0_0 = arith.constant 0 : index
    %0 = vector.load %arg2[%c0, %c0_0] : memref<8x1xf32, #tpu.memory_space<vmem>>, vector<8x1xf32>
    %c0_1 = arith.constant 0 : index
    %c0_2 = arith.constant 0 : index
    %1 = vector.load %arg3[%c0_1, %c0_2] : memref<1x128xf32, #tpu.memory_space<vmem>>, vector<1x128xf32>
    %2 = vector.broadcast %0 : vector<8x1xf32> to vector<8x128xf32>
    %3 = vector.broadcast %1 : vector<1x128xf32> to vector<8x128xf32>
    %4 = arith.mulf %2, %3 : vector<8x128xf32>
    %5 = math.cos %4 : vector<8x128xf32>
    %6 = math.sin %4 : vector<8x128xf32>
    %7 = tpu.concatenate %5, %6 in 1 : vector<8x128xf32>, vector<8x128xf32> -> vector<8x256xf32>
    %8 = arith.truncf %7 : vector<8x256xf32> to vector<8x256xbf16>
    %c0_3 = arith.constant 0 : index
    %c0_4 = arith.constant 0 : index
    %9 = vector.load %arg4[%c0_3, %c0_4] : memref<256x128xbf16, #tpu.memory_space<vmem>>, vector<256x128xbf16>
    %cst = arith.constant dense<0.000000e+00> : vector<8x128xf32>
    %10 = tpu.matmul %8, %9, %cst {dimension_numbers = #tpu.dot_dimension_numbers<[1], [0], [0], [1], [0, 0, 1, 1], [], []>} : vector<8x256xbf16>, vector<256x128xbf16>, vector<8x128xf32> -> vector<8x128xf32>
    %c0_5 = arith.constant 0 : index
    %c0_6 = arith.constant 0 : index
    %11 = vector.load %arg5[%c0_5, %c0_6] : memref<1x128xf32, #tpu.memory_space<vmem>>, vector<1x128xf32>
    %12 = vector.broadcast %11 : vector<1x128xf32> to vector<8x128xf32>
    %13 = arith.addf %10, %12 : vector<8x128xf32>
    %14 = arith.negf %13 : vector<8x128xf32>
    %15 = math.exp %14 : vector<8x128xf32>
    %cst_7 = arith.constant 1.000000e+00 : f32
    %16 = vector.broadcast %cst_7 : f32 to vector<8x128xf32>
    %17 = arith.addf %16, %15 : vector<8x128xf32>
    %18 = arith.divf %16, %17 : vector<8x128xf32>
    %19 = arith.mulf %13, %18 : vector<8x128xf32>
    %20 = arith.truncf %19 : vector<8x128xf32> to vector<8x128xbf16>
    %c0_8 = arith.constant 0 : index
    %c0_9 = arith.constant 0 : index
    %21 = vector.load %arg6[%c0_8, %c0_9] : memref<128x128xbf16, #tpu.memory_space<vmem>>, vector<128x128xbf16>
    %cst_10 = arith.constant dense<0.000000e+00> : vector<8x128xf32>
    %22 = tpu.matmul %20, %21, %cst_10 {dimension_numbers = #tpu.dot_dimension_numbers<[1], [0], [0], [1], [0, 0, 1, 1], [], []>} : vector<8x128xbf16>, vector<128x128xbf16>, vector<8x128xf32> -> vector<8x128xf32>
    %c0_11 = arith.constant 0 : index
    %c0_12 = arith.constant 0 : index
    %23 = vector.load %arg7[%c0_11, %c0_12] : memref<1x128xf32, #tpu.memory_space<vmem>>, vector<1x128xf32>
    %24 = vector.broadcast %23 : vector<1x128xf32> to vector<8x128xf32>
    %25 = arith.addf %22, %24 : vector<8x128xf32>
    %26 = arith.truncf %25 : vector<8x128xf32> to vector<8x128xbf16>
    %c0_13 = arith.constant 0 : index
    %c0_14 = arith.constant 0 : index
    %27 = vector.load %arg8[%c0_13, %c0_14] : memref<8x128xbf16, #tpu.memory_space<vmem>>, vector<8x128xbf16>
    tpu.vector_store %arg8[%c0_13, %c0_14], %26 {strides = array<i32>} : memref<8x128xbf16, #tpu.memory_space<vmem>>, vector<8x128xbf16>,
    return
  }
  func.func @transform_0(%arg0: i32, %arg1: i32) -> (i32, i32) {
    %c0_i32 = arith.constant 0 : i32
    %c0_i32_0 = arith.constant 0 : i32
    return %arg1, %c0_i32 : i32, i32
  }
  func.func @transform_1(%arg0: i32, %arg1: i32) -> (i32, i32) {
    %c0_i32 = arith.constant 0 : i32
    %c0_i32_0 = arith.constant 0 : i32
    %c0_i32_1 = arith.constant 0 : i32
    return %c0_i32, %c0_i32_0 : i32, i32
  }
  func.func @transform_2(%arg0: i32, %arg1: i32) -> (i32, i32) {
    %c0_i32 = arith.constant 0 : i32
    %c0_i32_0 = arith.constant 0 : i32
    %c0_i32_1 = arith.constant 0 : i32
    return %c0_i32, %c0_i32_0 : i32, i32
  }
  func.func @transform_3(%arg0: i32, %arg1: i32) -> (i32, i32) {
    %c0_i32 = arith.constant 0 : i32
    %c0_i32_0 = arith.constant 0 : i32
    %c0_i32_1 = arith.constant 0 : i32
    return %c0_i32, %c0_i32_0 : i32, i32
  }
  func.func @transform_4(%arg0: i32, %arg1: i32) -> (i32, i32) {
    %c0_i32 = arith.constant 0 : i32
    %c0_i32_0 = arith.constant 0 : i32
    return %c0_i32, %arg0 : i32, i32
  }
  func.func @transform_5(%arg0: i32, %arg1: i32) -> (i32, i32) {
    %c0_i32 = arith.constant 0 : i32
    %c0_i32_0 = arith.constant 0 : i32
    return %c0_i32, %arg0 : i32, i32
  }
  func.func @transform_6(%arg0: i32, %arg1: i32) -> (i32, i32) {
    %c0_i32 = arith.constant 0 : i32
    return %arg1, %arg0 : i32, i32
  }
}

</mosaic_0001>

<bundles_post_ra>
// kernel: timestep_embedder.1
= control target key start
LH: loop header
LB: loop body
LE: loop exit
PB: predicated region body
PF: predicated region fallthrough
CT: control target
= control target key end

     0   :  { %11 = vsyncpa [#allocation3], 0  ;;  %s916_s0 = inlined_call_operand.vmem [shape: f32[8,1], index: 0, kind: input, shape index: {}]   ;;  %s917_s1 = inlined_call_operand.vmem [shape: f32[1,128], index: 1, kind: input, shape index: {}]   ;;  %s918_s2 = inlined_call_operand.hbm [shape: bf16[256,128], index: 2, kind: input, shape index: {}]   ;;  %s919_s3 = inlined_call_operand.vmem [shape: f32[1,128], index: 3, kind: input, shape index: {}]   ;;  %s920_s4 = inlined_call_operand.hbm [shape: bf16[128,128], index: 4, kind: input, shape index: {}]   ;;  %s921_s5 = inlined_call_operand.vmem [shape: f32[1,128], index: 5, kind: input, shape index: {}]   ;;  %s922_s6 = inlined_call_operand.hbm [shape: bf16[8,128], index: 6, kind: output, shape index: {}]  }
   0x1   :  { %12 = vsyncpa [#allocation6], 0 }
   0x2   :  { %13 = vsyncpa [#allocation4], 0  ;;  %s798_s21 = smov [#allocation2]   ;;  %s726_s25 = scalar_lea.hbm %s918_s2, 2048 }
   0x3   :  { %s23_s22 = sshll.u32 %s798_s21, 4  ;;  %p727_p0 = scmp.ne.s32.totalorder %s918_s2, %s726_s25  ;;  %s24_s22 = int_to_ptr.vmem [resolvable:$true] %s23_s22 }
   0x4   :  { %p730_p1 = scmp.lt.u32.totalorder %s726_s25, %s918_s2 }
   0x6   :  { %p732_p2 = pnand %p730_p1, %p727_p0 }
   0x8   :  { %735 = shalt.err (!%p732_p2)
}
   0x9   :  { %s736_s30 = scalar_lea.vmem %s24_s22, 2048  ;;  %p741_p4 = scmp.lt.s32.totalorder %s24_s22, %s24_s22 }
   0xa   :  { %p737_p3 = scmp.ne.s32.totalorder %s24_s22, %s736_s30  ;;  %p742_p5 = scmp.lt.s32.totalorder %s736_s30, %s736_s30 }
   0xc   :  { %p743_p6 = por %p742_p5, %p741_p4 }
   0xe   :  { %p744_p7 = pnand %p743_p6, %p737_p3 }
  0x10   :  { %747 = shalt.err (!%p744_p7)
}
  0x11   :  { %s799_s7 = smov 64   ;;  %s800_s8 = smov 4  }
  0x12   :  { %29 = dma.hbm_to_vmem [thread:$0]  %s918_s2, 2048, %s24_s22, [#allocation3], %s799_s7, %s799_s7, %s800_s8  }
  0x13   :  { %s801_s11 = smov [#allocation5]   ;;  %s748_s15 = scalar_lea.hbm %s920_s4, 1024 }
  0x14   :  { %s37_s12 = sshll.u32 %s801_s11, 4  ;;  %p749_p8 = scmp.ne.s32.totalorder %s920_s4, %s748_s15  ;;  %s38_s12 = int_to_ptr.vmem [resolvable:$true] %s37_s12 }
  0x15   :  { %p752_p9 = scmp.lt.u32.totalorder %s748_s15, %s920_s4 }
  0x17   :  { %p754_p10 = pnand %p752_p9, %p749_p8 }
  0x19   :  { %757 = shalt.err (!%p754_p10)
}
  0x1a   :  { %s758_s20 = scalar_lea.vmem %s38_s12, 1024  ;;  %p763_p12 = scmp.lt.s32.totalorder %s38_s12, %s38_s12 }
  0x1b   :  { %p759_p11 = scmp.ne.s32.totalorder %s38_s12, %s758_s20  ;;  %p764_p13 = scmp.lt.s32.totalorder %s758_s20, %s758_s20 }
  0x1d   :  { %p765_p0 = por %p764_p13, %p763_p12 }
  0x1f   :  { %p766_p1 = pnand %p765_p0, %p759_p11 }
  0x21   :  { %769 = shalt.err (!%p766_p1)
}
  0x22   :  { %43 = dma.hbm_to_vmem [thread:$0]  %s920_s4, 1024, %s38_s12, [#allocation6], %s799_s7, %s799_s7, %s800_s8  }
  0x23   :  { %792 = dma.done.wait [#allocation3], 2048  }
  0x24   :  { %793 = vsyncadd [#allocation3], 4294965248 }
  0x25   :  { %794 = dma.done.wait [#allocation6], 1024  }
  0x26   :  { %795 = vsyncadd [#allocation6], 4294966272  ;;  %v802_v0 = vmov 0   ;;  %v53_v1 = vld [vmem:[%s916_s0] sm:$0xff]  ;;  %v696_v4 = vld [vmem:[#allocation2 + $0x48] sm:$0xff]  }
  0x27   :  { %693 = vset.pattern.permute.xlu0 %v802_v0  ;;  %v694_v2 = vld [vmem:[#allocation2 + $0x40] sm:$0xff]   ;;  %v697_v5 = vld [vmem:[#allocation2 + $0x8] sm:$0xff]   ;;  %v698_v6 = vld [vmem:[#allocation2 + $0x50] sm:$0xff]   ;;  %v803_v32 = vmov 2102212464  }
  0x28   :  { %57 = vperm.xlu0 %693, %v53_v1   ;;  %v695_v3 = vld [vmem:[#allocation2] sm:$0xff]   ;;  %624 = vmatprep.subr.bf16.mxu0 %v694_v2  ;;  %v699_v7 = vld [vmem:[#allocation2 + $0x10] sm:$0xff]   ;;  %v700_v8 = vld [vmem:[#allocation2 + $0x58] sm:$0xff]   ;;  %v804_v34 = vmov 920167782  }
  0x29   :  { %625 = vmatpush3.bf16.msra.mxu0 %v695_v3  ;;  %v701_v9 = vld [vmem:[#allocation2 + $0x18] sm:$0xff]   ;;  %v702_v10 = vld [vmem:[#allocation2 + $0x60] sm:$0xff]   ;;  %v704_v12 = vld [vmem:[#allocation2 + $0x68] sm:$0xff]   ;;  %v805_v38 = vmov 1326507024  }
  0x2a   :  { %626 = vmatprep.subr.bf16.mxu0 %v696_v4  ;;  %v703_v11 = vld [vmem:[#allocation2 + $0x20] sm:$0xff]   ;;  %v705_v13 = vld [vmem:[#allocation2 + $0x28] sm:$0xff]   ;;  %v706_v14 = vld [vmem:[#allocation2 + $0x70] sm:$0xff]   ;;  %v806_v40 = vmov 683565275  }
  0x2b   :  { %v707_v15 = vld [vmem:[#allocation2 + $0x30] sm:$0xff]   ;;  %v708_v16 = vld [vmem:[#allocation2 + $0x78] sm:$0xff]   ;;  %v588_v18 = vld [vmem:[%s917_s1] ss:$0 sm:$0xff]  ;;  %v807_v42 = vmov 2475754826  }
  0x2c   :  { %v709_v17 = vld [vmem:[#allocation2 + $0x38] sm:$0xff]   ;;  %v808_v45 = vmov 2131351028  }
  0x2d   :  { %627 = vmatpush3.bf16.msra.mxu0 %v697_v5 }
  0x2e   :  { %628 = vmatprep.subr.bf16.mxu0 %v698_v6 }
  0x31   :  { %629 = vmatpush3.bf16.msra.mxu0 %v699_v7 }
  0x32   :  { %630 = vmatprep.subr.bf16.mxu0 %v700_v8 }
  0x35   :  { %631 = vmatpush3.bf16.msra.mxu0 %v701_v9 }
  0x36   :  { %632 = vmatprep.subr.bf16.mxu0 %v702_v10 }
  0x39   :  { %633 = vmatpush3.bf16.msra.mxu0 %v703_v11 }
  0x3a   :  { %634 = vmatprep.subr.bf16.mxu0 %v704_v12 }
  0x3d   :  { %635 = vmatpush3.bf16.msra.mxu0 %v705_v13 }
  0x3e   :  { %636 = vmatprep.subr.bf16.mxu0 %v706_v14 }
  0x41   :  { %637 = vmatpush3.bf16.msra.mxu0 %v707_v15 }
  0x42   :  { %638 = vmatprep.subr.bf16.mxu0 %v708_v16 }
  0x45   :  { %639 = vmatpush3.bf16.msra.mxu0 %v709_v17 }
  0xa7   :  { %v58_v19 = vpop.permute.xlu0 %57 }
  0xa8   :  { %v877_v20 = vmul.f32 %v588_v18, %v58_v19 }
  0xaa   :  { %v70_v21 = vand.u32 2139095040, %v877_v20  ;;  %v67_v22 = vand.u32 2147483647, %v877_v20  ;;  %vm69_vm7 = vcmp.lt.s32.totalorder %v877_v20, 0  ;;  %vm159_vm15 = vweird.f32 %v877_v20 }
  0xac   :  { %v71_v23 = vshrl.u32 %v70_v21, 23  ;;  %v74_v25 = vand.u32 8388607, %v67_v22  ;;  %vm68_vm8 = vcmp.le.f32.partialorder %v67_v22, 0.7853982 }
  0xae   :  { %v589_v24 = vadd.s32 4294967169, %v71_v23  ;;  %v75_v28 = vor.u32 8388608, %v74_v25 }
  0xb0   :  { %v77_v26 = vadd.s32 1, %v589_v24  ;;  %v115_v36 = vshll.u32 %v75_v28, 8 }
  0xb2   :  { %vm78_vm0 = vcmp.gt.s32.totalorder %v77_v26, 0 }
  0xb3   :  { %v79_v27 = vsel %vm78_vm0, %v77_v26, 0  ;;  %vm810_vm0 = vmmov 0  }
  0xb4   :  { %v81_v29 = vand.u32 31, %v79_v27  ;;  %v80_v30 = vshrl.u32 %v79_v27, 5 }
  0xb6   :  { %v82_v31 = vsub.s32 32, %v81_v29  ;;  %v93_v33 = vshll.u32 %v803_v32, %v81_v29  ;;  %v96_v35 = vshll.u32 %v804_v34, %v81_v29  ;;  %v84_v41 = vshll.u32 %v806_v40, %v81_v29 }
  0xb7   :  { %v87_v44 = vshll.u32 %v807_v42, %v81_v29  ;;  %v90_v47 = vshll.u32 %v808_v45, %v81_v29  ;;  %vm102_vm1 = vcmp.lt.s32.totalorder %v80_v30, 4  ;;  %vm99_vm2 = vcmp.lt.s32.totalorder %v80_v30, 1 }
  0xb8   :  { %v94_v37 = vshrl.u32 %v804_v34, %v82_v31  ;;  %v97_v39 = vshrl.u32 %v805_v38, %v82_v31  ;;  %v85_v43 = vshrl.u32 %v807_v42, %v82_v31  ;;  %v88_v46 = vshrl.u32 %v808_v45, %v82_v31 }
  0xb9   :  { %v91_v48 = vshrl.u32 %v803_v32, %v82_v31  ;;  %v83_v52 = vshrl.u32 %v806_v40, %v82_v31  ;;  %vm100_vm3 = vcmp.lt.s32.totalorder %v80_v30, 2  ;;  %vm101_vm4 = vcmp.lt.s32.totalorder %v80_v30, 3 }
  0xba   :  { %v95_v49 = vor.u32 %v94_v37, %v93_v33  ;;  %v98_v50 = vor.u32 %v97_v39, %v96_v35  ;;  %v86_v51 = vor.u32 %v85_v43, %v84_v41  ;;  %v89_v53 = vor.u32 %v88_v46, %v87_v44 }
  0xbb   :  { %v92_v54 = vor.u32 %v91_v48, %v90_v47 }
  0xbc   :  { %v108_v55 = vsel %vm102_vm1, %v95_v49, 920167782  ;;  %v112_v56 = vsel %vm102_vm1, %v98_v50, 1326507024  ;;  %v107_v58 = vsel %vm99_vm2, %v86_v51, %v89_v53  ;;  %v103_v61 = vsel %vm99_vm2, %v83_v52, %v86_v51 }
  0xbd   :  { %v104_v57 = vsel %vm102_vm1, %v92_v54, 2102212464  ;;  %v109_v59 = vsel %vm101_vm4, %v92_v54, %v108_v55  ;;  %v111_v60 = vsel %vm99_vm2, %v89_v53, %v92_v54  ;;  %v113_v0 = vsel %vm101_vm4, %v95_v49, %v112_v56  ;;  %v710_v56 = vld [vmem:[#allocation5] sm:$0xff]  }
  0xbe   :  { %v105_v62 = vsel %vm101_vm4, %v89_v53, %v104_v57  ;;  %v110_v63 = vsel %vm100_vm3, %v107_v58, %v109_v59  ;;  %v114_v1 = vsel %vm100_vm3, %v111_v60, %v113_v0  ;;  %v809_v57 = vmov 0.0   ;;  %v711_v58 = vld [vmem:[#allocation5 + $0x8] sm:$0xff]   ;;  %v712_v59 = vld [vmem:[#allocation5 + $0x10] sm:$0xff]   ;;  %v714_v60 = vld [vmem:[#allocation5 + $0x20] sm:$0xff]  }
  0xbf   :  { %v883_v2 = vmul.u32.u64.low %v115_v36, %v110_v63  ;;  %v884_v3 = vmul.u32.u64.high %v115_v36, %v110_v63, %v883_v2  ;;  %v886_v4 = vmul.u32.u64.low %v115_v36, %v114_v1  ;;  %v887_v5 = vmul.u32.u64.high %v115_v36, %v114_v1, %v886_v4  ;;  %655 = vmatprep.subr.bf16.mxu1 %v809_v57  ;;  %671 = vmatprep.mubr.msk.bf16.mxu1 %vm810_vm0, %v809_v57  ;;  %v717_v63 = vld [vmem:[#allocation5 + $0x38] sm:$0xff]   ;;  %v597_v1 = vld [vmem:[%s919_s3] ss:$0 sm:$0xff]  ;;  %s811_s3 = smov [#allocation7]  }
  0xc0   :  { %v106_v6 = vsel %vm100_vm3, %v103_v61, %v105_v62  ;;  %656 = vmatpush3.bf16.msra.mxu1 %v710_v56  ;;  %v715_v61 = vld [vmem:[#allocation5 + $0x28] sm:$0xff]   ;;  %v716_v62 = vld [vmem:[#allocation5 + $0x30] sm:$0xff]   ;;  %s578_s27 = sshll.u32 %s811_s3, 4  ;;  %s579_s27 = int_to_ptr.vmem [resolvable:$true] %s578_s27 }
  0xc1   :  { %v125_v7 = vadd.s32 1, %v884_v3  ;;  %v122_v8 = vmul.u32 %v115_v36, %v106_v6  ;;  %vm124_vm5 = vc.u32 %v887_v5, %v883_v2  ;;  %v123_v21 = vadd.s32 %v883_v2, %v887_v5  ;;  %657 = vmatprep.subr.bf16.mxu1 %v809_v57  ;;  %s770_s28 = scalar_lea.vmem %s579_s27, 64  ;;  %p775_p3 = scmp.lt.s32.totalorder %s579_s27, %s579_s27 }
  0xc2   :  { %p771_p2 = scmp.ne.s32.totalorder %s579_s27, %s770_s28  ;;  %p776_p4 = scmp.lt.s32.totalorder %s770_s28, %s770_s28 }
  0xc3   :  { %v126_v9 = vsel %vm124_vm5, %v125_v7, %v884_v3 }
  0xc4   :  { %v127_v10 = vadd.s32 %v126_v9, %v122_v8  ;;  %658 = vmatpush3.bf16.msra.mxu1 %v711_v58  ;;  %p777_p5 = por %p776_p4, %p775_p3 }
  0xc5   :  { %659 = vmatprep.subr.bf16.mxu1 %v809_v57 }
  0xc6   :  { %v128_v11 = vadd.s32 536870912, %v127_v10  ;;  %p778_p6 = pnand %p777_p5, %p771_p2 }
  0xc8   :  { %v129_v12 = vshrl.u32 %v128_v11, 30  ;;  %660 = vmatpush3.bf16.msra.mxu1 %v712_v59 }
  0xc9   :  { %661 = vmatprep.subr.bf16.mxu1 %v809_v57 }
  0xca   :  { %v130_v13 = vshll.u32 %v129_v12, 30  ;;  %v153_v34 = vsub.s32 4, %v129_v12 }
  0xcc   :  { %v131_v14 = vsub.s32 %v127_v10, %v130_v13  ;;  %v154_v37 = vsel %vm69_vm7, %v153_v34, %v129_v12  ;;  %v615_v13 = vld [vmem:[%s921_s5] ss:$0 sm:$0xff] }
  0xcd   :  { %v156_v39 = vsel %vm68_vm8, 0, %v154_v37 }
  0xce   :  { %v133_v15 = vsub.s32 0, %v131_v14  ;;  %v263_v40 = vadd.s32 3, %v156_v39  ;;  %v160_v41 = vand.u32 3, %v156_v39 }
  0xd0   :  { %v590_v16 = vmin.u32 %v133_v15, %v131_v14  ;;  %v264_v42 = vand.u32 3, %v263_v40  ;;  %vm165_vm9 = vcmp.eq.s32.totalorder %v160_v41, 2  ;;  %vm162_vm11 = vcmp.eq.s32.totalorder %v160_v41, 0 }
  0xd1   :  { %vm161_vm13 = vcmp.lt.s32.totalorder %v160_v41, 2 }
  0xd2   :  { %v135_v17 = vclz %v590_v16  ;;  %vm269_vm10 = vcmp.eq.s32.totalorder %v264_v42, 2  ;;  %vm266_vm12 = vcmp.eq.s32.totalorder %v264_v42, 0  ;;  %vm265_vm14 = vcmp.lt.s32.totalorder %v264_v42, 2 }
  0xd4   :  { %v591_v18 = vadd.s32 4294967294, %v135_v17 }
  0xd6   :  { %vm592_vm6 = vcmp.lt.s32.totalorder %v591_v18, 0 }
  0xd7   :  { %v138_v19 = vsel %vm592_vm6, 0, %v591_v18 }
  0xd8   :  { %v139_v23 = vsub.s32 32, %v138_v19  ;;  %v143_v24 = vsub.s32 4294967266, %v138_v19  ;;  %v140_v25 = vshll.u32 %v131_v14, %v138_v19 }
  0xda   :  { %v141_v26 = vshrl.u32 %v123_v21, %v139_v23  ;;  %v144_v27 = vadd.s32 127, %v143_v24 }
  0xdc   :  { %v142_v28 = vor.u32 %v141_v26, %v140_v25  ;;  %v145_v29 = vshll.u32 %v144_v27, 23 }
  0xde   :  { %v146_v30 = vor.u32 4788187, %v145_v29  ;;  %v149_v32 = vcvt.s32.f32 %v142_v28 }
  0xe0   :  { %v147_v31 = vand.u32 2147483647, %v146_v30 }
  0xe2   :  { %v150_v33 = vmul.f32 %v149_v32, %v147_v31 }
  0xe4   :  { %v151_v35 = vxor.u32 2147483648, %v150_v33 }
  0xe6   :  { %v152_v36 = vsel %vm69_vm7, %v151_v35, %v150_v33 }
  0xe7   :  { %v155_v38 = vsel %vm68_vm8, %v877_v20, %v152_v36  ;;  %v713_v20 = vld [vmem:[#allocation5 + $0x18] sm:$0xff]  }
  0xe8   :  { %718 = vcosq.f32 %v155_v38  ;;  %662 = vmatpush3.bf16.msra.mxu1 %v713_v20 }
  0xe9   :  { %720 = vsinq.f32 %v155_v38  ;;  %663 = vmatprep.subr.bf16.mxu1 %v809_v57 }
  0xec   :  { %664 = vmatpush3.bf16.msra.mxu1 %v714_v60 }
  0xed   :  { %665 = vmatprep.subr.bf16.mxu1 %v809_v57 }
  0xf0   :  { %666 = vmatpush3.bf16.msra.mxu1 %v715_v61 }
  0xf1   :  { %667 = vmatprep.subr.bf16.mxu1 %v809_v57 }
  0xf2   :  { %v719_v43 = vpop.eup %718 }
  0xf3   :  { %v721_v44 = vpop.eup %720  ;;  %v166_v45 = vxor.u32 2147483648, %v719_v43 }
  0xf4   :  { %v163_v46 = vxor.u32 2147483648, %v721_v44  ;;  %668 = vmatpush3.bf16.msra.mxu1 %v716_v62 }
  0xf5   :  { %v167_v47 = vsel %vm165_vm9, %v166_v45, %v721_v44  ;;  %v271_v22 = vsel %vm269_vm10, %v166_v45, %v721_v44  ;;  %669 = vmatprep.subr.bf16.mxu1 %v809_v57 }
  0xf6   :  { %v164_v48 = vsel %vm162_vm11, %v719_v43, %v163_v46  ;;  %v268_v49 = vsel %vm266_vm12, %v719_v43, %v163_v46 }
  0xf7   :  { %v168_v50 = vsel %vm161_vm13, %v164_v48, %v167_v47  ;;  %v272_v51 = vsel %vm265_vm14, %v268_v49, %v271_v22 }
  0xf8   :  { %v169_v52 = vsel %vm159_vm15, nan, %v168_v50  ;;  %v273_v53 = vsel %vm159_vm15, nan, %v272_v51  ;;  %670 = vmatpush3.bf16.msra.mxu1 %v717_v63 }
  0xf9   :  { %v274_v54 = vpack.c.bf16 %v169_v52, %v169_v52  ;;  %v275_v55 = vpack.c.bf16 %v273_v53, %v273_v53 }
  0xfb   :  { %443 = vmatprep.mubr.bf16.mxu0 %v275_v55 }
  0xfc   :  { %444 = vmatmul.mubr.bf16.vlgmr.msra.gmra.mrb[0].mxu0 %v274_v54 }
 0x1cf   :  { %v640_v0 = vpop.f32.mrb[0].mxu0 }
 0x1d0   :  { %v641_v2 = vpop.f32.mrb[1].mxu0 }
 0x1d1   :  { %v642_v3 = vadd.f32 %v641_v2, %v640_v0  ;;  %v643_v4 = vpop.f32.mrb[2].mxu0 }
 0x1d2   :  { %v644_v5 = vpop.f32.mrb[3].mxu0 }
 0x1d3   :  { %v446_v6 = vadd.f32 %v642_v3, %v597_v1 }
 0x1d5   :  { %v614_v7 = vmul.f32 -1.442695, %v446_v6 }
 0x1d7   :  { %722 = vpow2.f32 %v614_v7 }
 0x1e1   :  { %v723_v8 = vpop.eup %722 }
 0x1e2   :  { %v454_v9 = vadd.f32 1.0, %v723_v8 }
 0x1e4   :  { %724 = vrcp.f32 %v454_v9 }
 0x1ee   :  { %v725_v10 = vpop.eup %724 }
 0x1ef   :  { %v457_v11 = vmul.f32 %v725_v10, %v446_v6 }
 0x1f1   :  { %v458_v12 = vpack.c.bf16 %v457_v11, %v457_v11 }
 0x1f3   :  { %672 = vmatmul.mubr.bf16.vlgmr.msra.gmra.mrb[0].mxu1 %v458_v12 }
 0x2c6   :  { %v564_v14 = vpop.f32.mrb[0].mxu1 }
 0x2c7   :  { %v565_v15 = vadd.f32 %v615_v13, %v564_v14  ;;  %v673_v16 = vpop.f32.mrb[1].mxu1 }
 0x2c8   :  { %v567_v17 = vpop.f32.mrb[2].mxu1 }
 0x2c9   :  { %v570_v18 = vpack.c.bf16 %v565_v15, %v565_v15  ;;  %v674_v19 = vpop.f32.mrb[3].mxu1 }
 0x2cb   :  { %571 = vst [vmem:[#allocation7] sm:$0xf] %v570_v18 }
 0x2cc   :  { %781 = shalt.err (!%p778_p6)
}
 0x2cd   :  { %s782_s5 = scalar_lea.hbm %s922_s6, 64 }
 0x2ce   :  { %p783_p7 = scmp.ne.s32.totalorder %s922_s6, %s782_s5  ;;  %p786_p8 = scmp.lt.u32.totalorder %s782_s5, %s922_s6 }
 0x2d0   :  { %p788_p9 = pnand %p786_p8, %p783_p7 }
 0x2d2   :  { %791 = shalt.err (!%p788_p9)
}
 0x2d3   :  { %581 = dma.vmem_to_hbm [thread:$0]  %s579_s27, 64, %s922_s6, [#allocation4]  }
 0x2d4   :  { %796 = dma.done.wait [#allocation4], 64  }
 0x2d5   :  { %797 = vsyncadd [#allocation4], 4294967232 }
 0x2d6   :  { %585 = vsyncpa [#allocation3], 1 }
 0x2d7   :  { %586 = vsyncpa [#allocation6], 1 }
 0x2d8   :  { %587 = vsyncpa [#allocation4], 1 }

</bundles_post_ra>
